<compile_context>
chip_gen: v7x
topology: tpu7x:2x2x1
jax: 0.10.0
libtpu: 0.0.40
codegen_flags: <defaults>
</compile_context>

<pallas_src>
import functools

import jax
import jax.numpy as jnp
from jax.experimental import pallas as pl
from jax.experimental.pallas import tpu as pltpu


def _round_up(x, m):
    return ((x + m - 1) // m) * m


def _conv_bn_relu_kernel(xm_ref, xh_ref, w_ref, shift_ref, o_ref, *,
                         KH, KW, WP, CH, HPAD, n_chunks, relu):
    # xm_ref:    (1, Cin, TL)       main spatial tile of the flattened padded image
    # xh_ref:    (1, Cin, CH)       halo = first CH elements after this tile
    # w_ref:     (KH*KW, Cout, Cin) BN-scale-folded weights, tap-major
    # shift_ref: (Cout, 1)          BN shift (beta - mean * scale)
    # o_ref:     (1, Cout, TL)      lane-dense output tile
    n_taps = KH * KW

    # Hoist the tiny per-tap weight matrices and the BN shift out of the chunk loop.
    w_taps = [w_ref[t] for t in range(n_taps)]          # each (Cout, Cin)
    shift = shift_ref[...]                               # (Cout, 1)

    # Process the tile in lane chunks so the f32 accumulator (Cout, CH) and the
    # (Cin, CH+HPAD) slab stay comfortably in vregs (no spills, no big scratch).
    for j in range(n_chunks):
        base = j * CH                                    # multiple of 128 (aligned)
        if j + 1 < n_chunks:
            slab = xm_ref[0, :, base:base + CH + HPAD]   # aligned slab load
        else:
            # last chunk: its window crosses into the halo block
            slab = jnp.concatenate(
                [xm_ref[0, :, base:base + CH], xh_ref[0, :, :HPAD]], axis=-1)

        acc = None
        for kh in range(KH):
            for kw in range(KW):
                off = kh * WP + kw
                x_tap = slab[:, off:off + CH]            # (Cin, CH) shifted view
                d = jnp.dot(w_taps[kh * KW + kw], x_tap,
                            preferred_element_type=jnp.float32)   # (Cout, CH)
                acc = d if acc is None else acc + d

        y = acc + shift                                   # BN shift (scale folded into w)
        if relu:
            y = jnp.maximum(y, 0.0)
        o_ref[0, :, base:base + CH] = y.astype(o_ref.dtype)


def conv2d_unit_forward(x_nchw, weight, gamma, beta, running_mean, running_var,
                        *, eps=1e-5, stride=1, padding=1, relu=True,
                        target_tile_lanes=32768):
    """Forward of Conv2dUnit (bn=True, relu=relu) with eval-mode BatchNorm."""
    assert stride == 1, "only stride=1 (module default) is implemented"
    N, C, H, W = x_nchw.shape
    O, Cw, KH, KW = weight.shape
    assert Cw == C

    Hp, Wp = H + 2 * padding, W + 2 * padding
    Ho, Wo = Hp - KH + 1, Wp - KW + 1
    L = Ho * Wp                                  # flattened output length (junk cols cropped later)
    halo = (KH - 1) * Wp + (KW - 1)              # extra flat elements a tile needs past its end
    HPAD = _round_up(max(halo, 1), 128)          # lane-aligned halo width actually read
    CH = max(1024, HPAD)                         # chunk width = halo-block width (multiple of 128)
    n_chunks = max(1, min(target_tile_lanes // CH, pl.cdiv(L, CH)))
    TL = n_chunks * CH                           # tile lanes (multiple of CH, hence of 128)
    T = pl.cdiv(L, TL)
    L_pad = T * TL
    Lin = L_pad + CH                             # flat input length incl. tile/halo tail pad
    assert halo <= HPAD <= CH and TL % CH == 0 and TL % 128 == 0

    # ---- glue (no transposes): pad spatially, flatten HxW, zero-pad the tail ----
    xp = jnp.pad(x_nchw, ((0, 0), (0, 0), (padding, padding), (padding, padding)))
    x_flat = xp.reshape(N, C, Hp * Wp)
    x_flat = jnp.pad(x_flat, ((0, 0), (0, 0), (0, Lin - Hp * Wp)))

    # fold BatchNorm (eval mode): scale into the weights, shift as epilogue add
    scale = (gamma / jnp.sqrt(running_var + eps)).astype(jnp.float32)
    shift = (beta - running_mean * scale).astype(jnp.float32)
    w_taps = jnp.transpose(weight * scale[:, None, None, None], (2, 3, 0, 1))
    w_taps = w_taps.reshape(KH * KW, O, C).astype(x_nchw.dtype)   # (taps, Cout, Cin)
    shift2 = shift.reshape(O, 1)

    kernel = functools.partial(_conv_bn_relu_kernel, KH=KH, KW=KW, WP=Wp,
                               CH=CH, HPAD=HPAD, n_chunks=n_chunks, relu=relu)

    out = pl.pallas_call(
        kernel,
        out_shape=jax.ShapeDtypeStruct((N, O, L_pad), x_nchw.dtype),
        grid_spec=pltpu.PrefetchScalarGridSpec(
            num_scalar_prefetch=0,
            grid=(N, T),
            in_specs=[
                # main tile: (Cin, TL) slab of the flattened padded image
                pl.BlockSpec((1, C, TL), lambda n, t: (n, 0, t)),
                # halo: first CH elements after the tile (= start of tile t+1),
                # expressed as a second blocked view of the same array
                pl.BlockSpec((1, C, CH), lambda n, t: (n, 0, (t + 1) * n_chunks)),
                pl.BlockSpec((KH * KW, O, C), lambda n, t: (0, 0, 0)),
                pl.BlockSpec((O, 1), lambda n, t: (0, 0)),
            ],
            out_specs=pl.BlockSpec((1, O, TL), lambda n, t: (n, 0, t)),
        ),
        compiler_params=pltpu.CompilerParams(
            dimension_semantics=("parallel", "parallel")),
    )(x_flat, x_flat, w_taps, shift2)

    # ---- glue: drop the (KW-1)/W junk columns + tile tail, restore NCHW ----
    y = out[:, :, :L].reshape(N, O, Ho, Wp)[:, :, :, :Wo]
    return y


if __name__ == "__main__":
    key = jax.random.PRNGKey(0)
    k_x, k_w, k_g, k_b, k_m, k_v = jax.random.split(key, 6)

    # Conv2dUnit(in_channels=4, out_channels=8, kernel_size=3, stride=1, padding=1)
    N, Cin, H, W = 2, 4, 16, 16
    Cout, K = 8, 3

    x = jax.random.normal(k_x, (N, Cin, H, W), jnp.float32)
    weight = 0.1 * jax.random.normal(k_w, (Cout, Cin, K, K), jnp.float32)   # OIHW
    gamma = 1.0 + 0.1 * jax.random.normal(k_g, (Cout,), jnp.float32)
    beta = 0.1 * jax.random.normal(k_b, (Cout,), jnp.float32)
    running_mean = 0.1 * jax.random.normal(k_m, (Cout,), jnp.float32)
    running_var = jnp.abs(1.0 + 0.1 * jax.random.normal(k_v, (Cout,), jnp.float32))

    out = conv2d_unit_forward(x, weight, gamma, beta, running_mean, running_var,
                              stride=1, padding=1, relu=True)
    out = jax.block_until_ready(out)

    # pure-JAX reference (same eval-mode BN semantics)
    ref = jax.lax.conv_general_dilated(
        x, weight, window_strides=(1, 1), padding=((1, 1), (1, 1)),
        dimension_numbers=("NCHW", "OIHW", "NCHW"))
    scale = gamma / jnp.sqrt(running_var + 1e-5)
    shift = beta - running_mean * scale
    ref = ref * scale[None, :, None, None] + shift[None, :, None, None]
    ref = jnp.maximum(ref, 0.0)

    assert out.shape == (N, Cout, H, W), out.shape
    assert jnp.allclose(out, ref, atol=1e-4, rtol=1e-4), float(jnp.max(jnp.abs(out - ref)))
    print("KERNEL_OK")
</pallas_src>

<mosaic_0001>
module attributes {stable_mosaic.version = 11 : i64} {
  func.func @_conv_bn_relu_kernel(%arg0: i32, %arg1: i32, %arg2: memref<1x4x1024xf32, #tpu.memory_space<vmem>>, %arg3: memref<1x4x1024xf32, #tpu.memory_space<vmem>>, %arg4: memref<9x8x4xf32, #tpu.memory_space<vmem>>, %arg5: memref<8x1xf32, #tpu.memory_space<vmem>>, %arg6: memref<1x8x1024xf32, #tpu.memory_space<vmem>>) attributes {dimension_semantics = [#tpu.dimension_semantics<parallel>, #tpu.dimension_semantics<parallel>], iteration_bounds = array<i64: 2, 1>, scalar_prefetch = 0 : i64, scratch_operands = 0 : i64, tpu.core_type = #tpu.core_type<tc>, window_params = [{transform_indices = @transform_0, window_bounds = array<i64: 1, 4, 1024>}, {transform_indices = @transform_1, window_bounds = array<i64: 1, 4, 1024>}, {pipeline_mode = #tpu.pipeline_mode<synchronous>, transform_indices = @transform_2, window_bounds = array<i64: 9, 8, 4>}, {pipeline_mode = #tpu.pipeline_mode<synchronous>, transform_indices = @transform_3, window_bounds = array<i64: 8, 1>}, {transform_indices = @transform_4, window_bounds = array<i64: 1, 8, 1024>}]} {
    %c0 = arith.constant 0 : index
    %c0_0 = arith.constant 0 : index
    %c0_1 = arith.constant 0 : index
    %0 = vector.load %arg4[%c0, %c0_0, %c0_1] : memref<9x8x4xf32, #tpu.memory_space<vmem>>, vector<1x8x4xf32>
    %1 = vector.shape_cast %0 : vector<1x8x4xf32> to vector<8x4xf32>
    %c1 = arith.constant 1 : index
    %c0_2 = arith.constant 0 : index
    %c0_3 = arith.constant 0 : index
    %2 = vector.load %arg4[%c1, %c0_2, %c0_3] : memref<9x8x4xf32, #tpu.memory_space<vmem>>, vector<1x8x4xf32>
    %3 = vector.shape_cast %2 : vector<1x8x4xf32> to vector<8x4xf32>
    %c2 = arith.constant 2 : index
    %c0_4 = arith.constant 0 : index
    %c0_5 = arith.constant 0 : index
    %4 = vector.load %arg4[%c2, %c0_4, %c0_5] : memref<9x8x4xf32, #tpu.memory_space<vmem>>, vector<1x8x4xf32>
    %5 = vector.shape_cast %4 : vector<1x8x4xf32> to vector<8x4xf32>
    %c3 = arith.constant 3 : index
    %c0_6 = arith.constant 0 : index
    %c0_7 = arith.constant 0 : index
    %6 = vector.load %arg4[%c3, %c0_6, %c0_7] : memref<9x8x4xf32, #tpu.memory_space<vmem>>, vector<1x8x4xf32>
    %7 = vector.shape_cast %6 : vector<1x8x4xf32> to vector<8x4xf32>
    %c4 = arith.constant 4 : index
    %c0_8 = arith.constant 0 : index
    %c0_9 = arith.constant 0 : index
    %8 = vector.load %arg4[%c4, %c0_8, %c0_9] : memref<9x8x4xf32, #tpu.memory_space<vmem>>, vector<1x8x4xf32>
    %9 = vector.shape_cast %8 : vector<1x8x4xf32> to vector<8x4xf32>
    %c5 = arith.constant 5 : index
    %c0_10 = arith.constant 0 : index
    %c0_11 = arith.constant 0 : index
    %10 = vector.load %arg4[%c5, %c0_10, %c0_11] : memref<9x8x4xf32, #tpu.memory_space<vmem>>, vector<1x8x4xf32>
    %11 = vector.shape_cast %10 : vector<1x8x4xf32> to vector<8x4xf32>
    %c6 = arith.constant 6 : index
    %c0_12 = arith.constant 0 : index
    %c0_13 = arith.constant 0 : index
    %12 = vector.load %arg4[%c6, %c0_12, %c0_13] : memref<9x8x4xf32, #tpu.memory_space<vmem>>, vector<1x8x4xf32>
    %13 = vector.shape_cast %12 : vector<1x8x4xf32> to vector<8x4xf32>
    %c7 = arith.constant 7 : index
    %c0_14 = arith.constant 0 : index
    %c0_15 = arith.constant 0 : index
    %14 = vector.load %arg4[%c7, %c0_14, %c0_15] : memref<9x8x4xf32, #tpu.memory_space<vmem>>, vector<1x8x4xf32>
    %15 = vector.shape_cast %14 : vector<1x8x4xf32> to vector<8x4xf32>
    %c8 = arith.constant 8 : index
    %c0_16 = arith.constant 0 : index
    %c0_17 = arith.constant 0 : index
    %16 = vector.load %arg4[%c8, %c0_16, %c0_17] : memref<9x8x4xf32, #tpu.memory_space<vmem>>, vector<1x8x4xf32>
    %17 = vector.shape_cast %16 : vector<1x8x4xf32> to vector<8x4xf32>
    %c0_18 = arith.constant 0 : index
    %c0_19 = arith.constant 0 : index
    %18 = vector.load %arg5[%c0_18, %c0_19] : memref<8x1xf32, #tpu.memory_space<vmem>>, vector<8x1xf32>
    %c0_20 = arith.constant 0 : index
    %c0_21 = arith.constant 0 : index
    %c0_22 = arith.constant 0 : index
    %19 = vector.load %arg2[%c0_20, %c0_21, %c0_22] : memref<1x4x1024xf32, #tpu.memory_space<vmem>>, vector<1x4x1024xf32>
    %20 = vector.shape_cast %19 : vector<1x4x1024xf32> to vector<4x1024xf32>
    %c0_23 = arith.constant 0 : index
    %c0_24 = arith.constant 0 : index
    %c0_25 = arith.constant 0 : index
    %21 = vector.load %arg3[%c0_23, %c0_24, %c0_25] : memref<1x4x1024xf32, #tpu.memory_space<vmem>>, vector<1x4x128xf32>
    %22 = vector.shape_cast %21 : vector<1x4x128xf32> to vector<4x128xf32>
    %23 = tpu.concatenate %20, %22 in 1 : vector<4x1024xf32>, vector<4x128xf32> -> vector<4x1152xf32>
    %24 = vector.extract_strided_slice %23 {offsets = [0, 0], sizes = [4, 1024], strides = [1, 1]} : vector<4x1152xf32> to vector<4x1024xf32>
    %cst = arith.constant dense<0.000000e+00> : vector<8x1024xf32>
    %25 = tpu.matmul %1, %24, %cst {dimension_numbers = #tpu.dot_dimension_numbers<[1], [0], [0], [1], [0, 0, 1, 1], [], []>} : vector<8x4xf32>, vector<4x1024xf32>, vector<8x1024xf32> -> vector<8x1024xf32>
    %26 = vector.extract_strided_slice %23 {offsets = [0, 1], sizes = [4, 1024], strides = [1, 1]} : vector<4x1152xf32> to vector<4x1024xf32>
    %cst_26 = arith.constant dense<0.000000e+00> : vector<8x1024xf32>
    %27 = tpu.matmul %3, %26, %cst_26 {dimension_numbers = #tpu.dot_dimension_numbers<[1], [0], [0], [1], [0, 0, 1, 1], [], []>} : vector<8x4xf32>, vector<4x1024xf32>, vector<8x1024xf32> -> vector<8x1024xf32>
    %28 = arith.addf %25, %27 : vector<8x1024xf32>
    %29 = vector.extract_strided_slice %23 {offsets = [0, 2], sizes = [4, 1024], strides = [1, 1]} : vector<4x1152xf32> to vector<4x1024xf32>
    %cst_27 = arith.constant dense<0.000000e+00> : vector<8x1024xf32>
    %30 = tpu.matmul %5, %29, %cst_27 {dimension_numbers = #tpu.dot_dimension_numbers<[1], [0], [0], [1], [0, 0, 1, 1], [], []>} : vector<8x4xf32>, vector<4x1024xf32>, vector<8x1024xf32> -> vector<8x1024xf32>
    %31 = arith.addf %28, %30 : vector<8x1024xf32>
    %32 = vector.extract_strided_slice %23 {offsets = [0, 18], sizes = [4, 1024], strides = [1, 1]} : vector<4x1152xf32> to vector<4x1024xf32>
    %cst_28 = arith.constant dense<0.000000e+00> : vector<8x1024xf32>
    %33 = tpu.matmul %7, %32, %cst_28 {dimension_numbers = #tpu.dot_dimension_numbers<[1], [0], [0], [1], [0, 0, 1, 1], [], []>} : vector<8x4xf32>, vector<4x1024xf32>, vector<8x1024xf32> -> vector<8x1024xf32>
    %34 = arith.addf %31, %33 : vector<8x1024xf32>
    %35 = vector.extract_strided_slice %23 {offsets = [0, 19], sizes = [4, 1024], strides = [1, 1]} : vector<4x1152xf32> to vector<4x1024xf32>
    %cst_29 = arith.constant dense<0.000000e+00> : vector<8x1024xf32>
    %36 = tpu.matmul %9, %35, %cst_29 {dimension_numbers = #tpu.dot_dimension_numbers<[1], [0], [0], [1], [0, 0, 1, 1], [], []>} : vector<8x4xf32>, vector<4x1024xf32>, vector<8x1024xf32> -> vector<8x1024xf32>
    %37 = arith.addf %34, %36 : vector<8x1024xf32>
    %38 = vector.extract_strided_slice %23 {offsets = [0, 20], sizes = [4, 1024], strides = [1, 1]} : vector<4x1152xf32> to vector<4x1024xf32>
    %cst_30 = arith.constant dense<0.000000e+00> : vector<8x1024xf32>
    %39 = tpu.matmul %11, %38, %cst_30 {dimension_numbers = #tpu.dot_dimension_numbers<[1], [0], [0], [1], [0, 0, 1, 1], [], []>} : vector<8x4xf32>, vector<4x1024xf32>, vector<8x1024xf32> -> vector<8x1024xf32>
    %40 = arith.addf %37, %39 : vector<8x1024xf32>
    %41 = vector.extract_strided_slice %23 {offsets = [0, 36], sizes = [4, 1024], strides = [1, 1]} : vector<4x1152xf32> to vector<4x1024xf32>
    %cst_31 = arith.constant dense<0.000000e+00> : vector<8x1024xf32>
    %42 = tpu.matmul %13, %41, %cst_31 {dimension_numbers = #tpu.dot_dimension_numbers<[1], [0], [0], [1], [0, 0, 1, 1], [], []>} : vector<8x4xf32>, vector<4x1024xf32>, vector<8x1024xf32> -> vector<8x1024xf32>
    %43 = arith.addf %40, %42 : vector<8x1024xf32>
    %44 = vector.extract_strided_slice %23 {offsets = [0, 37], sizes = [4, 1024], strides = [1, 1]} : vector<4x1152xf32> to vector<4x1024xf32>
    %cst_32 = arith.constant dense<0.000000e+00> : vector<8x1024xf32>
    %45 = tpu.matmul %15, %44, %cst_32 {dimension_numbers = #tpu.dot_dimension_numbers<[1], [0], [0], [1], [0, 0, 1, 1], [], []>} : vector<8x4xf32>, vector<4x1024xf32>, vector<8x1024xf32> -> vector<8x1024xf32>
    %46 = arith.addf %43, %45 : vector<8x1024xf32>
    %47 = vector.extract_strided_slice %23 {offsets = [0, 38], sizes = [4, 1024], strides = [1, 1]} : vector<4x1152xf32> to vector<4x1024xf32>
    %cst_33 = arith.constant dense<0.000000e+00> : vector<8x1024xf32>
    %48 = tpu.matmul %17, %47, %cst_33 {dimension_numbers = #tpu.dot_dimension_numbers<[1], [0], [0], [1], [0, 0, 1, 1], [], []>} : vector<8x4xf32>, vector<4x1024xf32>, vector<8x1024xf32> -> vector<8x1024xf32>
    %49 = arith.addf %46, %48 : vector<8x1024xf32>
    %50 = vector.broadcast %18 : vector<8x1xf32> to vector<8x1024xf32>
    %51 = arith.addf %49, %50 : vector<8x1024xf32>
    %cst_34 = arith.constant 0.000000e+00 : f32
    %52 = vector.broadcast %cst_34 : f32 to vector<8x1024xf32>
    %53 = arith.maximumf %51, %52 : vector<8x1024xf32>
    %c0_35 = arith.constant 0 : index
    %c0_36 = arith.constant 0 : index
    %c0_37 = arith.constant 0 : index
    %54 = vector.load %arg6[%c0_35, %c0_36, %c0_37] : memref<1x8x1024xf32, #tpu.memory_space<vmem>>, vector<1x8x1024xf32>
    %55 = vector.shape_cast %54 : vector<1x8x1024xf32> to vector<8x1024xf32>
    %56 = vector.shape_cast %53 : vector<8x1024xf32> to vector<1x8x1024xf32>
    tpu.vector_store %arg6[%c0_35, %c0_36, %c0_37], %56 {strides = array<i32>} : memref<1x8x1024xf32, #tpu.memory_space<vmem>>, vector<1x8x1024xf32>,
    return
  }
  func.func @transform_0(%arg0: i32, %arg1: i32) -> (i32, i32, i32) {
    %c0_i32 = arith.constant 0 : i32
    %c0_i32_0 = arith.constant 0 : i32
    return %arg0, %c0_i32, %arg1 : i32, i32, i32
  }
  func.func @transform_1(%arg0: i32, %arg1: i32) -> (i32, i32, i32) {
    %c1_i32 = arith.constant 1 : i32
    %0 = arith.addi %arg1, %c1_i32 : i32
    %c1_i32_0 = arith.constant 1 : i32
    %1 = arith.muli %0, %c1_i32_0 : i32
    %c0_i32 = arith.constant 0 : i32
    %c0_i32_1 = arith.constant 0 : i32
    return %arg0, %c0_i32, %1 : i32, i32, i32
  }
  func.func @transform_2(%arg0: i32, %arg1: i32) -> (i32, i32, i32) {
    %c0_i32 = arith.constant 0 : i32
    %c0_i32_0 = arith.constant 0 : i32
    %c0_i32_1 = arith.constant 0 : i32
    %c0_i32_2 = arith.constant 0 : i32
    return %c0_i32, %c0_i32_0, %c0_i32_1 : i32, i32, i32
  }
  func.func @transform_3(%arg0: i32, %arg1: i32) -> (i32, i32) {
    %c0_i32 = arith.constant 0 : i32
    %c0_i32_0 = arith.constant 0 : i32
    %c0_i32_1 = arith.constant 0 : i32
    return %c0_i32, %c0_i32_0 : i32, i32
  }
  func.func @transform_4(%arg0: i32, %arg1: i32) -> (i32, i32, i32) {
    %c0_i32 = arith.constant 0 : i32
    %c0_i32_0 = arith.constant 0 : i32
    return %arg0, %c0_i32, %arg1 : i32, i32, i32
  }
}

</mosaic_0001>

<bundles_post_ra>
// kernel: tpu_custom_call.1
= control target key start
LH: loop header
LB: loop body
LE: loop exit
PB: predicated region body
PF: predicated region fallthrough
CT: control target
= control target key end

     0   :  { %9 = vsyncpa [#allocation3], 0  ;;  %s4515_s0 = inlined_call_operand.hbm [shape: f32[2,4,2048], index: 0, kind: input, shape index: {}]   ;;  %s4516_s1 = inlined_call_operand.hbm [shape: f32[2,4,2048], index: 1, kind: input, shape index: {}]   ;;  %s4517_s2 = inlined_call_operand.vmem [shape: f32[9,8,4], index: 2, kind: input, shape index: {}]   ;;  %s4518_s3 = inlined_call_operand.vmem [shape: f32[8,1], index: 3, kind: input, shape index: {}]   ;;  %s4519_s4 = inlined_call_operand.hbm [shape: f32[2,8,1024], index: 4, kind: output, shape index: {}]  }
   0x1   :  { %11 = vsyncpa [#allocation3 + $0x1], 0 }
   0x2   :  { %12 = vsyncpa [#allocation6], 0 }
   0x3   :  { %14 = vsyncpa [#allocation6 + $0x1], 0 }
   0x4   :  { %15 = vsyncpa [#allocation4], 0 }
   0x5   :  { %17 = vsyncpa [#allocation4 + $0x1], 0  ;;  %s3942_s15 = smov 0   ;;  %s3944_s16 = smov 0  }
   0x6   :  { %s3946_s17 = smov 0   ;;  %s3948_s18 = smov 0  }
   0x7   :  { %s3950_s19 = smov 0   ;;  %s3952_s20 = smov 0  }
   0x8 LB: > { %s3471_s21 = sadd.s32 4294967295, %s3902_s20   ;;  %s3472_s22 = sadd.s32 4294967294, %s3902_s20   ;;  %s3902_s20 = sphi %s3952_s20, %s23_s20   ;;  %s3898_s19 = sphi %s3950_s19, %s4539_s19   ;;  %s3894_s18 = sphi %s3948_s18, %s4538_s18   ;;  %s3890_s17 = sphi %s3946_s17, %s4537_s17   ;;  %s3886_s16 = sphi %s3944_s16, %s4536_s16   ;;  %s3882_s15 = sphi %s3942_s15, %s4535_s15  }
   0x9   : > { %s35_s23 = sadd.s32 1, %s3898_s19  ;;  %s44_s24 = sadd.s32 1, %s3890_s17 }
   0xa   : > { %p37_p0 = scmp.ge.s32.totalorder %s35_s23, 2  ;;  %p51_p1 = scmp.ne.s32.totalorder %s3890_s17, %s3886_s16 }
   0xb   : > { %p52_p2 = scmp.eq.s32.totalorder %s3902_s20, 0  ;;  %p57_p3 = scmp.ne.s32.totalorder %s3886_s16, %s3882_s15 }
   0xc   : > { %s4541_s23 = smov (%p37_p0, %s35_s23), 0  ;;  %p58_p5 = scmp.eq.s32.totalorder %s3471_s21, 0 }
   0xd   : > { %p3983_p4 = por %p52_p2, %p51_p1  ;;  %s39_s26 = ssub.s32 %s3898_s19, %s4541_s23 }
   0xe   : > { %p155_p6 = scmp.eq.s32.totalorder %s3471_s21, 1  ;;  %p42_p7 = scmp.eq.s32.totalorder %s39_s26, 0 }
   0xf   : > { %p3989_p8 = por %p58_p5, %p57_p3  ;;  %p161_p10 = scmp.eq.s32.totalorder %s3472_s22, 1 }
  0x10   : > { %p3993_p9 = por %p155_p6, %p51_p1  ;;  %p3690_p13 = scmp.lt.s32.totalorder %s3902_s20, 2 }
  0x11   : > { %s4523_s27 = scalar_select %p3989_p8, 1, 0 }
  0x12   : > { %s4524_s28 = scalar_select %p3993_p9, 1, 0 }
  0x13   : > { %s3998_s29 = scalar_select %p42_p7, %s3890_s17, %s44_s24  }
  0x14   : > { %p4000_p11 = por %p161_p10, %p57_p3  ;;  %s4007_s5 = sand.u32 1, %s3890_s17  }
  0x15   : > { %s3475_s6 = sshll.u32 %s4007_s5, 5  ;;  %s3606_s7 = sshll.u32 %s3898_s19, 10 }
  0x16   : > { %s4525_s30 = scalar_select %p4000_p11, 1, 0 }
  0x17   : > { %s4016_s10 = scalar_lea.hbm %s4515_s0, %s3606_s7  ;;  %s191_s11 = scalar_lea.vmem [#allocation2], %s3475_s6 }
  0x18   : > { %s201_s12 = sshll.u32 %s191_s11, 4  ;;  %p4024_p0 = pnand %p3690_p13, %p3983_p4  ;;  %s4020_s12 = int_to_ptr.vmem [resolvable:$true] %s201_s12 }
  0x19   : > { %s188_s14 = scalar_lea.sflag [#allocation3], %s4007_s5  ;;  %s3755_s21 = scalar_lea.hbm %s4016_s10, 512 }
  0x1a   : > { %p3756_p3 = scmp.ne.s32.totalorder %s4016_s10, %s3755_s21  ;;  %p3757_p5 = pneg %p4024_p0 }
  0x1b   : > { %s3760_s25 = scalar_lea.hbm %s4515_s0, 2048  ;;  %p3761_p4 = scmp.lt.u32.totalorder %s4016_s10, %s4515_s0 }
  0x1c   : > { %p3758_p6 = pnand %p3757_p5, %p3756_p3  ;;  %p3762_p10 = scmp.lt.u32.totalorder %s3760_s25, %s3755_s21 }
  0x1d   : > { %p3764_p12 = scmp.lt.u32.totalorder %s3755_s21, %s4016_s10 }
  0x1e   : > { %p3759_p7 = pneg %p3758_p6  ;;  %p3763_p13 = por %p3762_p10, %p3761_p4 }
  0x20   : > { %p3765_p1 = por %p3764_p12, %p3763_p13 }
  0x22   : > { %p3766_p2 = pnand %p3765_p1, %p3759_p7 }
  0x24   : > { %3769 = shalt.err (!%p3766_p2)
}
  0x25   : > { %s3770_s9 = scalar_lea.vmem %s4020_s12, 512  ;;  %s3904_s11 = smov [#allocation2]  }
  0x26   : > { %p3771_p3 = scmp.ne.s32.totalorder %s4020_s12, %s3770_s9  ;;  %s3775_s22 = sshll.u32 %s3904_s11, 4  ;;  %s3776_s22 = int_to_ptr.vmem [resolvable:$false] %s3775_s22 }
  0x27   : > { %s3777_s24 = scalar_lea.vmem %s3776_s22, 1024  ;;  %p3778_p9 = scmp.lt.s32.totalorder %s4020_s12, %s3776_s22 }
  0x28   : > { %p3773_p6 = pnand %p3771_p3, %p3757_p5  ;;  %p3779_p4 = scmp.lt.s32.totalorder %s3777_s24, %s3770_s9 }
  0x2a   : > { %p3774_p11 = pneg %p3773_p6  ;;  %p3780_p10 = por %p3779_p4, %p3778_p9 }
  0x2c   : > { %p3781_p12 = pnand %p3780_p10, %p3774_p11 }
  0x2e   : > { %3784 = shalt.err (!%p3781_p12)
}
  0x2f   : > { %3682 = dma.hbm_to_vmem [thread:$0]  (!%p4024_p0), %s4016_s10, 512, %s4020_s12, %s188_s14  }
  0x30   : > { %p4527_p1 = scmp.lt.s32.totalorder %s3902_s20, 3  ;;  %p4528_p2 = scmp.ge.s32.totalorder %s3902_s20, 1 }
  0x31   : > { %s3402_s8 = scalar_lea.hbm %s4516_s1, %s3606_s7  ;;  %s212_s9 = scalar_lea.vmem [#allocation5], %s3475_s6 }
  0x32   : > { %p4060_p7 = pnand %p4528_p2, %p4527_p1  ;;  %s223_s11 = sshll.u32 %s212_s9, 4  ;;  %s224_s11 = int_to_ptr.vmem [resolvable:$true] %s223_s11 }
  0x33   : > { %s4071_s22 = scalar_lea.hbm %s3402_s8, 512  ;;  %s209_s10 = scalar_lea.sflag [#allocation6], %s4007_s5 }
  0x34   : > { %s4529_s21 = scalar_select %p4060_p7, 1, 0 }
  0x35   : > { %s3815_s12 = scalar_lea.hbm %s3402_s8, 1024  ;;  %s3790_s7 = scalar_lea.hbm %s4516_s1, 2048 }
  0x36   : > { %p3786_p9 = scmp.ne.s32.totalorder %s4071_s22, %s3815_s12  ;;  %p3791_p3 = scmp.lt.u32.totalorder %s4071_s22, %s4516_s1 }
  0x37   : > { %p3792_p6 = scmp.lt.u32.totalorder %s3790_s7, %s3815_s12  ;;  %p3794_p10 = scmp.lt.u32.totalorder %s3815_s12, %s4071_s22 }
  0x38   : > { %p3788_p11 = pnand %p3786_p9, %p3757_p5 }
  0x39   : > { %p3793_p4 = por %p3792_p6, %p3791_p3 }
  0x3a   : > { %p3789_p13 = pneg %p3788_p11 }
  0x3b   : > { %p3795_p12 = por %p3794_p10, %p3793_p4 }
  0x3d   : > { %p3796_p1 = pnand %p3795_p12, %p3789_p13 }
  0x3f   : > { %3799 = shalt.err (!%p3796_p1)
}
  0x40   : > { %s3800_s5 = scalar_lea.vmem %s224_s11, 512  ;;  %s3905_s26 = smov [#allocation5]  }
  0x41   : > { %p3801_p2 = scmp.ne.s32.totalorder %s224_s11, %s3800_s5  ;;  %s3805_s8 = sshll.u32 %s3905_s26, 4  ;;  %s3806_s8 = int_to_ptr.vmem [resolvable:$false] %s3805_s8 }
  0x42   : > { %s3807_s9 = scalar_lea.vmem %s3806_s8, 1024  ;;  %p3808_p8 = scmp.lt.s32.totalorder %s224_s11, %s3806_s8 }
  0x43   : > { %p3803_p9 = pnand %p3801_p2, %p3757_p5  ;;  %p3809_p7 = scmp.lt.s32.totalorder %s3807_s9, %s3800_s5 }
  0x45   : > { %p3804_p11 = pneg %p3803_p9  ;;  %p3810_p3 = por %p3809_p7, %p3808_p8 }
  0x47   : > { %p3811_p6 = pnand %p3810_p3, %p3804_p11 }
  0x49   : > { %3814 = shalt.err (!%p3811_p6)
}
  0x4a   : > { %3685 = dma.hbm_to_vmem [thread:$0]  (!%p4024_p0), %s4071_s22, 512, %s224_s11, %s209_s10  }
  0x4b   : > { %p4530_p13 = scmp.ne.s32.totalorder %s4529_s21, 0 }
  0x4c   : > { %s4095_s12 = sand.u32 (!%p4530_p13), 1, %s3886_s16   ;;  %p4531_p5 = scmp.ne.s32.totalorder (!%p4530_p13), %s4523_s27, 0 }
  0x4d   : > { %232 = sbr.rel (%p4530_p13) target bundleno = 579 (0x243), region = 36  ;;  %s3482_s14 = sshll.u32 (!%p4530_p13), %s4095_s12, 5 }
  0x4e   : > { %s235_s24 = scalar_lea.sflag (!%p4530_p13), [#allocation3], %s4095_s12  ;;  %s238_s7 = scalar_lea.vmem (!%p4530_p13), [#allocation2], %s3482_s14 }
  0x54   : > { %3869 = dma.done.wait (%p4531_p5), %s235_s24, 512  }
  0x55   : > { %3871 = vsyncadd (%p4531_p5), %s235_s24, 4294966784  ;;  %s244_s13 = scalar_lea.sflag [#allocation6], %s4095_s12  ;;  %s247_s11 = scalar_lea.vmem [#allocation5], %s3482_s14 }
  0x56   : > { %3873 = dma.done.wait (%p4531_p5), %s244_s13, 512  }
  0x57   : > { %3875 = vsyncadd (%p4531_p5), %s244_s13, 4294966784  ;;  %v3906_v0 = vmov 0.0   ;;  %v4110_v1 = vld [vmem:[%s238_s7 + $0x10] sm:$0xff]  ;;  %v4112_v2 = vld [vmem:[%s238_s7 + $0x8] sm:$0xff]  ;;  %s3907_s21 = smov 127   ;;  %s3908_s27 = smov 126  }
  0x58   : > { %425 = vmatprep.mubr.f32.mxu0 %v3906_v0  ;;  %496 = vmatprep.mubr.f32.mxu1 %v3906_v0  ;;  %v4118_v3 = vcombine.high %v4112_v2, %v4112_v2  ;;  %v4120_v4 = vld [vmem:[%s238_s7] sm:$0xff]  ;;  %v4126_v5 = vcombine.high %v4110_v1, %v4110_v1  ;;  %v4132_v7 = vld [vmem:[%s238_s7 + $0x18] sm:$0xff]  ;;  %s3909_s22 = smov 110   ;;  %s3910_s10 = smov 109   ;;  %vm331_vm0 = vcmask 1039360   ;;  %vm344_vm1 = vcmask 1043456  }
  0x59   : > { %321 = vrot.lane.b32.xlu1 %v4110_v1, %s3907_s21  ;;  %317 = vrot.lane.b32.xlu0 %v4112_v2, %s3907_s21  ;;  %v4130_v6 = vcombine.high %v4120_v4, %v4120_v4  ;;  %v4138_v8 = vcombine.high %v4132_v7, %v4132_v7  ;;  %v4142_v9 = vld [vmem:[%s247_s11] sm:$0xf]  ;;  %s3911_s25 = smov 108   ;;  %s3912_s6 = smov 92   ;;  %v3485_v16 = vld [vmem:[%s4517_s2 + $0x8] sm:$0xff]  ;;  %vm340_vm2 = vcmask 31744  }
  0x5a   : > { %s3913_s5 = smov 91   ;;  %s3914_s9 = smov 90   ;;  %vm966_vm3 = vcmask 1031168   ;;  %v281_v29 = vld [vmem:[%s4517_s2] sm:$0xff]  ;;  %v3486_v40 = vld [vmem:[%s4517_s2 + $0x10] sm:$0xff]  ;;  %vm1304_vm4 = vcmask 900096  }
  0x5b   : > { %v298_v47 = vld [vmem:[%s4518_s3] sm:$0xff]  ;;  %v3915_v50 = vmov 0   ;;  %v3487_v56 = vld [vmem:[%s4517_s2 + $0x18] sm:$0xff]  ;;  %vm1642_vm5 = vcmask 891904   ;;  %vm1980_vm6 = vcmask 883712   ;;  %vm2318_vm7 = vcmask 752640  }
  0x5c   : > { %3750 = vset.pattern.permute.xlu0 %v3915_v50  ;;  %vm2656_vm8 = vcmask 744448   ;;  %vm2994_vm9 = vcmask 736256   ;;  %s3484_s13 = sshll.u32 %s4095_s12, 6  ;;  %p4532_p0 = scmp.ne.s32.totalorder %s4524_s28, 0 }
  0x5d   : > { %319 = vrot.lane.b32.xlu1 %v4118_v3, %s3907_s21  ;;  %313 = vrot.lane.b32.xlu0 %v4120_v4, %s3907_s21  ;;  %s276_s11 = scalar_lea.vmem [#allocation7], %s3484_s13 }
  0x61   : > { %323 = vrot.lane.b32.xlu1 %v4126_v5, %s3907_s21  ;;  %315 = vrot.lane.b32.xlu0 %v4130_v6, %s3907_s21 }
  0x65   : > { %327 = vrot.lane.b32.xlu1 %v4138_v8, %s3907_s21  ;;  %325 = vrot.lane.b32.xlu0 %v4132_v7, %s3907_s21 }
  0x69   : > { %950 = vrot.lane.b32.xlu1 %v4130_v6, %s3908_s27  ;;  %329 = vrot.lane.b32.xlu0 %v4142_v9, %s3907_s21  ;;  %s3608_s21 = sshll.u32 %s3894_s18, 10  ;;  %s3916_s18 = smov [#allocation7]  }
  0x6a   : > { %s3820_s26 = sshll.u32 %s3916_s18, 4  ;;  %s3821_s26 = int_to_ptr.vmem [resolvable:$false] %s3820_s26 }
  0x6b   : > { %s3822_s8 = scalar_lea.vmem %s3821_s26, 2048 }
  0x6d   : > { %954 = vrot.lane.b32.xlu1 %v4118_v3, %s3908_s27  ;;  %952 = vrot.lane.b32.xlu0 %v4112_v2, %s3908_s27 }
  0x71   : > { %948 = vrot.lane.b32.xlu1 %v4120_v4, %s3908_s27  ;;  %956 = vrot.lane.b32.xlu0 %v4110_v1, %s3908_s27 }
  0x75   : > { %960 = vrot.lane.b32.xlu1 %v4132_v7, %s3908_s27  ;;  %958 = vrot.lane.b32.xlu0 %v4126_v5, %s3908_s27 }
  0x79   : > { %964 = vrot.lane.b32.xlu1 %v4142_v9, %s3908_s27  ;;  %962 = vrot.lane.b32.xlu0 %v4138_v8, %s3908_s27  ;;  %s3360_s27 = sshll.u32 %s276_s11, 4  ;;  %s4468_s27 = int_to_ptr.vmem [resolvable:$true] %s3360_s27 }
  0x7a   : > { %p3823_p10 = scmp.lt.s32.totalorder %s4468_s27, %s3821_s26 }
  0x7d   : > { %1290 = vrot.lane.b32.xlu1 %v4112_v2, %s3909_s22  ;;  %1288 = vrot.lane.b32.xlu0 %v4130_v6, %s3909_s22 }
  0x81   : > { %1294 = vrot.lane.b32.xlu1 %v4110_v1, %s3909_s22  ;;  %1292 = vrot.lane.b32.xlu0 %v4118_v3, %s3909_s22 }
  0x85   : > { %1296 = vrot.lane.b32.xlu1 %v4126_v5, %s3909_s22  ;;  %1286 = vrot.lane.b32.xlu0 %v4120_v4, %s3909_s22 }
  0x89   : > { %1300 = vrot.lane.b32.xlu1 %v4138_v8, %s3909_s22  ;;  %1298 = vrot.lane.b32.xlu0 %v4132_v7, %s3909_s22 }
  0x8d   : > { %1626 = vrot.lane.b32.xlu1 %v4130_v6, %s3910_s10  ;;  %1302 = vrot.lane.b32.xlu0 %v4142_v9, %s3909_s22 }
  0x91   : > { %1630 = vrot.lane.b32.xlu1 %v4118_v3, %s3910_s10  ;;  %1628 = vrot.lane.b32.xlu0 %v4112_v2, %s3910_s10 }
  0x95   : > { %1624 = vrot.lane.b32.xlu1 %v4120_v4, %s3910_s10  ;;  %1632 = vrot.lane.b32.xlu0 %v4110_v1, %s3910_s10 }
  0x99   : > { %1636 = vrot.lane.b32.xlu1 %v4132_v7, %s3910_s10  ;;  %1634 = vrot.lane.b32.xlu0 %v4126_v5, %s3910_s10 }
  0x9d   : > { %1640 = vrot.lane.b32.xlu1 %v4142_v9, %s3910_s10  ;;  %1638 = vrot.lane.b32.xlu0 %v4138_v8, %s3910_s10 }
  0xa1   : > { %1966 = vrot.lane.b32.xlu1 %v4112_v2, %s3911_s25  ;;  %1964 = vrot.lane.b32.xlu0 %v4130_v6, %s3911_s25 }
  0xa5   : > { %1970 = vrot.lane.b32.xlu1 %v4110_v1, %s3911_s25  ;;  %1968 = vrot.lane.b32.xlu0 %v4118_v3, %s3911_s25 }
  0xa9   : > { %1972 = vrot.lane.b32.xlu1 %v4126_v5, %s3911_s25  ;;  %1962 = vrot.lane.b32.xlu0 %v4120_v4, %s3911_s25 }
  0xad   : > { %1976 = vrot.lane.b32.xlu1 %v4138_v8, %s3911_s25  ;;  %1974 = vrot.lane.b32.xlu0 %v4132_v7, %s3911_s25 }
  0xb1   : > { %2302 = vrot.lane.b32.xlu1 %v4130_v6, %s3912_s6  ;;  %1978 = vrot.lane.b32.xlu0 %v4142_v9, %s3911_s25  ;;  %s4466_s25 = scalar_lea.hbm %s4519_s4, %s3608_s21 }
  0xb5   : > { %2306 = vrot.lane.b32.xlu1 %v4118_v3, %s3912_s6  ;;  %2304 = vrot.lane.b32.xlu0 %v4112_v2, %s3912_s6 }
  0xb9   : > { %2300 = vrot.lane.b32.xlu1 %v4120_v4, %s3912_s6  ;;  %2308 = vrot.lane.b32.xlu0 %v4110_v1, %s3912_s6 }
  0xbd   : > { %2312 = vrot.lane.b32.xlu1 %v4132_v7, %s3912_s6  ;;  %2310 = vrot.lane.b32.xlu0 %v4126_v5, %s3912_s6 }
  0xc1   : > { %2316 = vrot.lane.b32.xlu1 %v4142_v9, %s3912_s6  ;;  %2314 = vrot.lane.b32.xlu0 %v4138_v8, %s3912_s6  ;;  %s3344_s6 = scalar_lea.sflag [#allocation4], %s4095_s12 }
  0xc5   : > { %2642 = vrot.lane.b32.xlu1 %v4112_v2, %s3913_s5  ;;  %2640 = vrot.lane.b32.xlu0 %v4130_v6, %s3913_s5 }
  0xc9   : > { %2646 = vrot.lane.b32.xlu1 %v4110_v1, %s3913_s5  ;;  %2644 = vrot.lane.b32.xlu0 %v4118_v3, %s3913_s5 }
  0xcb   : > { %v322_v10 = vpop.permute.xlu1 %321  ;;  %v318_v11 = vpop.permute.xlu0 %317 }
  0xcd   : > { %2648 = vrot.lane.b32.xlu1 %v4126_v5, %s3913_s5  ;;  %2638 = vrot.lane.b32.xlu0 %v4120_v4, %s3913_s5 }
  0xcf   : > { %v320_v12 = vpop.permute.xlu1 %319  ;;  %v314_v13 = vpop.permute.xlu0 %313 }
  0xd0   : > { %v335_v14 = vsel %vm331_vm0, %v320_v12, %v322_v10  ;;  %v334_v15 = vsel %vm331_vm0, %v318_v11, %v320_v12 }
  0xd1   : > { %3496 = vmatprep.subr.msk.mxu1 %vm344_vm1, %v335_v14  ;;  %2652 = vrot.lane.b32.xlu1 %v4138_v8, %s3913_s5 }
  0xd2   : > { %2650 = vrot.lane.b32.xlu0 %v4132_v7, %s3913_s5  ;;  %3497 = vmatpush1.msk.msra.mxu1 %vm344_vm1, %v334_v15 }
  0xd3   : > { %v324_v17 = vpop.permute.xlu1 %323  ;;  %v316_v18 = vpop.permute.xlu0 %315  ;;  %3498 = vmatmul.mubr.msk.f32.vlgmr.msra.gmra.mrb[0].mxu1 %vm340_vm2, %v3485_v16 }
  0xd4   : > { %v333_v19 = vsel %vm331_vm0, %v316_v18, %v318_v11  ;;  %v332_v20 = vsel %vm331_vm0, %v314_v13, %v316_v18  ;;  %638 = vmatprep.mubr.f32.mxu1 %v3906_v0  ;;  %v336_v24 = vsel %vm331_vm0, %v322_v10, %v324_v17  ;;  %v3488_v10 = vld [vmem:[%s4517_s2 + $0x20] sm:$0xff] }
  0xd5   : > { %2978 = vrot.lane.b32.xlu1 %v4130_v6, %s3914_s9  ;;  %3493 = vmatprep.subr.msk.mxu0 %vm344_vm1, %v333_v19 }
  0xd6   : > { %2654 = vrot.lane.b32.xlu0 %v4142_v9, %s3913_s5  ;;  %3494 = vmatpush1.msk.msra.mxu0 %vm344_vm1, %v332_v20  ;;  %s3816_s5 = scalar_lea.vmem %s4468_s27, 1024 }
  0xd7   : > { %v328_v21 = vpop.permute.xlu1 %327  ;;  %v326_v22 = vpop.permute.xlu0 %325  ;;  %3495 = vmatmul.mubr.msk.f32.vlgmr.msra.gmra.mrb[0].mxu0 %vm340_vm2, %v3485_v16  ;;  %p3817_p8 = scmp.ne.s32.totalorder %s4468_s27, %s3816_s5  ;;  %p3824_p12 = scmp.lt.s32.totalorder %s3822_s8, %s3816_s5 }
  0xd8   : > { %v337_v23 = vsel %vm331_vm0, %v324_v17, %v326_v22  ;;  %567 = vmatprep.mubr.f32.mxu0 %v3906_v0  ;;  %v338_v28 = vsel %vm331_vm0, %v326_v22, %v328_v21 }
  0xd9   : > { %2982 = vrot.lane.b32.xlu1 %v4118_v3, %s3914_s9  ;;  %3499 = vmatprep.subr.msk.mxu0 %vm344_vm1, %v337_v23  ;;  %p3818_p7 = pnand %p3817_p8, %p4532_p0  ;;  %p3825_p1 = por %p3824_p12, %p3823_p10 }
  0xda   : > { %2980 = vrot.lane.b32.xlu0 %v4112_v2, %s3914_s9  ;;  %3500 = vmatpush1.msk.msra.mxu0 %vm344_vm1, %v336_v24 }
  0xdb   : > { %v951_v25 = vpop.permute.xlu1 %950  ;;  %v330_v26 = vpop.permute.xlu0 %329  ;;  %3501 = vmatmul.mubr.msk.f32.vlgmr.msra.gmra.mrb[2].mxu0 %vm340_vm2, %v3485_v16  ;;  %3505 = vmatprep.subr.msk.mxu0 %vm344_vm1, %v4130_v6  ;;  %p3819_p4 = pneg %p3818_p7 }
  0xdc   : > { %v339_v27 = vsel %vm331_vm0, %v328_v21, %v330_v26  ;;  %3506 = vmatpush1.msk.msra.mxu0 %vm344_vm1, %v4120_v4  ;;  %728 = vmatprep.mubr.f32.mxu0 %v3906_v0 }
  0xdd   : > { %2976 = vrot.lane.b32.xlu1 %v4120_v4, %s3914_s9  ;;  %3502 = vmatprep.subr.msk.mxu1 %vm344_vm1, %v339_v27  ;;  %p3826_p2 = pnand %p3825_p1, %p3819_p4 }
  0xde   : > { %2984 = vrot.lane.b32.xlu0 %v4110_v1, %s3914_s9  ;;  %3503 = vmatpush1.msk.msra.mxu1 %vm344_vm1, %v338_v28 }
  0xdf   : > { %v955_v30 = vpop.permute.xlu1 %954  ;;  %v953_v31 = vpop.permute.xlu0 %952  ;;  %3504 = vmatmul.mubr.msk.f32.vlgmr.msra.gmra.mrb[2].mxu1 %vm340_vm2, %v3485_v16  ;;  %3511 = vmatprep.subr.msk.mxu0 %vm344_vm1, %v4126_v5 }
  0xe0   : > { %v968_v32 = vsel %vm966_vm3, %v951_v25, %v953_v31  ;;  %3507 = vmatmul.mubr.msk.f32.vlgmr.msra.gmra.mrb[0].mxu0 %vm340_vm2, %v281_v29  ;;  %3508 = vmatprep.subr.msk.mxu1 %vm344_vm1, %v4118_v3  ;;  %v969_v41 = vsel %vm966_vm3, %v953_v31, %v955_v30 }
  0xe1   : > { %3512 = vmatpush1.msk.msra.mxu0 %vm344_vm1, %v4110_v1  ;;  %2988 = vrot.lane.b32.xlu1 %v4132_v7, %s3914_s9 }
  0xe2   : > { %2986 = vrot.lane.b32.xlu0 %v4126_v5, %s3914_s9  ;;  %3517 = vmatprep.subr.msk.mxu0 %vm344_vm1, %v968_v32 }
  0xe3   : > { %3509 = vmatpush1.msk.msra.mxu1 %vm344_vm1, %v4112_v2  ;;  %799 = vmatprep.mubr.f32.mxu1 %v3906_v0  ;;  %v949_v33 = vpop.permute.xlu1 %948  ;;  %v957_v34 = vpop.permute.xlu0 %956 }
  0xe4   : > { %v970_v35 = vsel %vm966_vm3, %v955_v30, %v957_v34  ;;  %3510 = vmatmul.mubr.msk.f32.vlgmr.msra.gmra.mrb[0].mxu1 %vm340_vm2, %v281_v29  ;;  %3514 = vmatprep.subr.msk.mxu1 %vm344_vm1, %v4138_v8  ;;  %v967_v36 = vsel %vm966_vm3, %v949_v33, %v951_v25 }
  0xe5   : > { %870 = vmatprep.mubr.f32.mxu0 %v3906_v0  ;;  %3515 = vmatpush1.msk.msra.mxu1 %vm344_vm1, %v4132_v7 }
  0xe6   : > { %2992 = vrot.lane.b32.xlu1 %v4142_v9, %s3914_s9  ;;  %2990 = vrot.lane.b32.xlu0 %v4138_v8, %s3914_s9 }
  0xe7   : > { %3513 = vmatmul.mubr.msk.f32.vlgmr.msra.gmra.mrb[2].mxu0 %vm340_vm2, %v281_v29  ;;  %3520 = vmatprep.subr.msk.mxu1 %vm344_vm1, %v970_v35  ;;  %v961_v37 = vpop.permute.xlu1 %960  ;;  %v959_v38 = vpop.permute.xlu0 %958 }
  0xe8   : > { %3518 = vmatpush1.msk.msra.mxu0 %vm344_vm1, %v967_v36  ;;  %941 = vmatprep.mubr.f32.mxu1 %v3906_v0  ;;  %v972_v39 = vsel %vm966_vm3, %v959_v38, %v961_v37  ;;  %v971_v42 = vsel %vm966_vm3, %v957_v34, %v959_v38 }
  0xe9   : > { %3516 = vmatmul.mubr.msk.f32.vlgmr.msra.gmra.mrb[2].mxu1 %vm340_vm2, %v281_v29  ;;  %1058 = vmatprep.mubr.f32.mxu0 %v3906_v0  ;;  %v3489_v29 = vld [vmem:[%s4517_s2 + $0x28] sm:$0xff] }
  0xea   : > { %3521 = vmatpush1.msk.msra.mxu1 %vm344_vm1, %v969_v41  ;;  %3523 = vmatprep.subr.msk.mxu0 %vm344_vm1, %v972_v39 }
  0xeb   : > { %3519 = vmatmul.mubr.msk.f32.vlgmr.msra.gmra.mrb[0].mxu0 %vm340_vm2, %v3486_v40  ;;  %v965_v43 = vpop.permute.xlu1 %964  ;;  %v963_v44 = vpop.permute.xlu0 %962  ;;  %1129 = vmatprep.mubr.f32.mxu1 %v3906_v0 }
  0xec   : > { %3524 = vmatpush1.msk.msra.mxu0 %vm344_vm1, %v971_v42  ;;  %v973_v45 = vsel %vm966_vm3, %v961_v37, %v963_v44  ;;  %v974_v46 = vsel %vm966_vm3, %v963_v44, %v965_v43  ;;  %1200 = vmatprep.mubr.f32.mxu0 %v3906_v0 }
  0xed   : > { %3526 = vmatprep.subr.msk.mxu1 %vm344_vm1, %v974_v46  ;;  %3522 = vmatmul.mubr.msk.f32.vlgmr.msra.gmra.mrb[0].mxu1 %vm340_vm2, %v3486_v40  ;;  %v3490_v46 = vld [vmem:[%s4517_s2 + $0x30] sm:$0xff] }
  0xee   : > { %3527 = vmatpush1.msk.msra.mxu1 %vm344_vm1, %v973_v45  ;;  %1271 = vmatprep.mubr.f32.mxu1 %v3906_v0 }
  0xef   : > { %v1291_v48 = vpop.permute.xlu1 %1290  ;;  %v1289_v49 = vpop.permute.xlu0 %1288  ;;  %3525 = vmatmul.mubr.msk.f32.vlgmr.msra.gmra.mrb[2].mxu0 %vm340_vm2, %v3486_v40  ;;  %3316 = vperm.xlu0 %3750, %v298_v47  }
  0xf0   : > { %v1306_v51 = vsel %vm1304_vm4, %v1289_v49, %v1291_v48  ;;  %1396 = vmatprep.mubr.f32.mxu0 %v3906_v0 }
  0xf1   : > { %3529 = vmatprep.subr.msk.mxu0 %vm344_vm1, %v1306_v51  ;;  %3528 = vmatmul.mubr.msk.f32.vlgmr.msra.gmra.mrb[2].mxu1 %vm340_vm2, %v3486_v40 }
  0xf2   : > { %1467 = vmatprep.mubr.f32.mxu1 %v3906_v0 }
  0xf3   : > { %v1295_v52 = vpop.permute.xlu1 %1294  ;;  %v1293_v53 = vpop.permute.xlu0 %1292 }
  0xf4   : > { %v1307_v54 = vsel %vm1304_vm4, %v1291_v48, %v1293_v53  ;;  %v1308_v55 = vsel %vm1304_vm4, %v1293_v53, %v1295_v52 }
  0xf5   : > { %3532 = vmatprep.subr.msk.mxu1 %vm344_vm1, %v1308_v55 }
  0xf6   : > { %3533 = vmatpush1.msk.msra.mxu1 %vm344_vm1, %v1307_v54 }
  0xf7   : > { %v1297_v57 = vpop.permute.xlu1 %1296  ;;  %v1287_v58 = vpop.permute.xlu0 %1286  ;;  %3534 = vmatmul.mubr.msk.f32.vlgmr.msra.gmra.mrb[0].mxu1 %vm340_vm2, %v3487_v56 }
  0xf8   : > { %v1305_v59 = vsel %vm1304_vm4, %v1287_v58, %v1289_v49  ;;  %1609 = vmatprep.mubr.f32.mxu1 %v3906_v0  ;;  %v1309_v63 = vsel %vm1304_vm4, %v1295_v52, %v1297_v57 }
  0xf9   : > { %3530 = vmatpush1.msk.msra.mxu0 %vm344_vm1, %v1305_v59 }
  0xfa   : > { %3531 = vmatmul.mubr.msk.f32.vlgmr.msra.gmra.mrb[0].mxu0 %vm340_vm2, %v3487_v56 }
  0xfb   : > { %v1301_v60 = vpop.permute.xlu1 %1300  ;;  %v1299_v61 = vpop.permute.xlu0 %1298  ;;  %1538 = vmatprep.mubr.f32.mxu0 %v3906_v0 }
  0xfc   : > { %v1310_v62 = vsel %vm1304_vm4, %v1297_v57, %v1299_v61  ;;  %v1311_v4 = vsel %vm1304_vm4, %v1299_v61, %v1301_v60 }
  0xfd   : > { %3535 = vmatprep.subr.msk.mxu0 %vm344_vm1, %v1310_v62 }
  0xfe   : > { %3536 = vmatpush1.msk.msra.mxu0 %vm344_vm1, %v1309_v63 }
  0xff   : > { %v1627_v1 = vpop.permute.xlu1 %1626  ;;  %v1303_v2 = vpop.permute.xlu0 %1302  ;;  %3537 = vmatmul.mubr.msk.f32.vlgmr.msra.gmra.mrb[2].mxu0 %vm340_vm2, %v3487_v56 }
 0x100   : > { %v1312_v3 = vsel %vm1304_vm4, %v1301_v60, %v1303_v2  ;;  %1734 = vmatprep.mubr.f32.mxu0 %v3906_v0  ;;  %v3491_v2 = vld [vmem:[%s4517_s2 + $0x38] sm:$0xff] }
 0x101   : > { %3538 = vmatprep.subr.msk.mxu1 %vm344_vm1, %v1312_v3 }
 0x102   : > { %3539 = vmatpush1.msk.msra.mxu1 %vm344_vm1, %v1311_v4 }
 0x103   : > { %v1631_v5 = vpop.permute.xlu1 %1630  ;;  %v1629_v6 = vpop.permute.xlu0 %1628  ;;  %3540 = vmatmul.mubr.msk.f32.vlgmr.msra.gmra.mrb[2].mxu1 %vm340_vm2, %v3487_v56 }
 0x104   : > { %v1644_v7 = vsel %vm1642_vm5, %v1627_v1, %v1629_v6  ;;  %1805 = vmatprep.mubr.f32.mxu1 %v3906_v0  ;;  %v1645_v13 = vsel %vm1642_vm5, %v1629_v6, %v1631_v5 }
 0x105   : > { %3541 = vmatprep.subr.msk.mxu0 %vm344_vm1, %v1644_v7 }
 0x107   : > { %v1625_v8 = vpop.permute.xlu1 %1624  ;;  %v1633_v9 = vpop.permute.xlu0 %1632 }
 0x108   : > { %v1643_v11 = vsel %vm1642_vm5, %v1625_v8, %v1627_v1  ;;  %v1646_v12 = vsel %vm1642_vm5, %v1631_v5, %v1633_v9 }
 0x109   : > { %3542 = vmatpush1.msk.msra.mxu0 %vm344_vm1, %v1643_v11  ;;  %3544 = vmatprep.subr.msk.mxu1 %vm344_vm1, %v1646_v12 }
 0x10a   : > { %3545 = vmatpush1.msk.msra.mxu1 %vm344_vm1, %v1645_v13  ;;  %3543 = vmatmul.mubr.msk.f32.vlgmr.msra.gmra.mrb[0].mxu0 %vm340_vm2, %v3488_v10 }
 0x10b   : > { %v1637_v14 = vpop.permute.xlu1 %1636  ;;  %v1635_v15 = vpop.permute.xlu0 %1634  ;;  %3546 = vmatmul.mubr.msk.f32.vlgmr.msra.gmra.mrb[0].mxu1 %vm340_vm2, %v3488_v10  ;;  %1876 = vmatprep.mubr.f32.mxu0 %v3906_v0 }
 0x10c   : > { %v1647_v16 = vsel %vm1642_vm5, %v1633_v9, %v1635_v15  ;;  %v1648_v17 = vsel %vm1642_vm5, %v1635_v15, %v1637_v14  ;;  %1947 = vmatprep.mubr.f32.mxu1 %v3906_v0 }
 0x10d   : > { %3547 = vmatprep.subr.msk.mxu0 %vm344_vm1, %v1648_v17 }
 0x10e   : > { %3548 = vmatpush1.msk.msra.mxu0 %vm344_vm1, %v1647_v16 }
 0x10f   : > { %v1641_v18 = vpop.permute.xlu1 %1640  ;;  %v1639_v19 = vpop.permute.xlu0 %1638  ;;  %3549 = vmatmul.mubr.msk.f32.vlgmr.msra.gmra.mrb[2].mxu0 %vm340_vm2, %v3488_v10 }
 0x110   : > { %v1649_v20 = vsel %vm1642_vm5, %v1637_v14, %v1639_v19  ;;  %v1650_v21 = vsel %vm1642_vm5, %v1639_v19, %v1641_v18  ;;  %2072 = vmatprep.mubr.f32.mxu0 %v3906_v0  ;;  %v3492_v18 = vld [vmem:[%s4517_s2 + $0x40] sm:$0xff] }
 0x111   : > { %3550 = vmatprep.subr.msk.mxu1 %vm344_vm1, %v1650_v21 }
 0x112   : > { %3551 = vmatpush1.msk.msra.mxu1 %vm344_vm1, %v1649_v20 }
 0x113   : > { %v1967_v22 = vpop.permute.xlu1 %1966  ;;  %v1965_v23 = vpop.permute.xlu0 %1964  ;;  %3552 = vmatmul.mubr.msk.f32.vlgmr.msra.gmra.mrb[2].mxu1 %vm340_vm2, %v3488_v10 }
 0x114   : > { %v1982_v24 = vsel %vm1980_vm6, %v1965_v23, %v1967_v22  ;;  %2143 = vmatprep.mubr.f32.mxu1 %v3906_v0 }
 0x115   : > { %3553 = vmatprep.subr.msk.mxu0 %vm344_vm1, %v1982_v24 }
 0x117   : > { %v1971_v25 = vpop.permute.xlu1 %1970  ;;  %v1969_v26 = vpop.permute.xlu0 %1968 }
 0x118   : > { %v1983_v27 = vsel %vm1980_vm6, %v1967_v22, %v1969_v26  ;;  %v1984_v28 = vsel %vm1980_vm6, %v1969_v26, %v1971_v25 }
 0x119   : > { %3556 = vmatprep.subr.msk.mxu1 %vm344_vm1, %v1984_v28 }
 0x11a   : > { %3557 = vmatpush1.msk.msra.mxu1 %vm344_vm1, %v1983_v27 }
 0x11b   : > { %v1973_v30 = vpop.permute.xlu1 %1972  ;;  %v1963_v31 = vpop.permute.xlu0 %1962  ;;  %3558 = vmatmul.mubr.msk.f32.vlgmr.msra.gmra.mrb[0].mxu1 %vm340_vm2, %v3489_v29 }
 0x11c   : > { %v1981_v32 = vsel %vm1980_vm6, %v1963_v31, %v1965_v23  ;;  %2285 = vmatprep.mubr.f32.mxu1 %v3906_v0  ;;  %v1985_v36 = vsel %vm1980_vm6, %v1971_v25, %v1973_v30 }
 0x11d   : > { %3554 = vmatpush1.msk.msra.mxu0 %vm344_vm1, %v1981_v32 }
 0x11e   : > { %3555 = vmatmul.mubr.msk.f32.vlgmr.msra.gmra.mrb[0].mxu0 %vm340_vm2, %v3489_v29 }
 0x11f   : > { %v1977_v33 = vpop.permute.xlu1 %1976  ;;  %v1975_v34 = vpop.permute.xlu0 %1974  ;;  %2214 = vmatprep.mubr.f32.mxu0 %v3906_v0 }
 0x120   : > { %v1986_v35 = vsel %vm1980_vm6, %v1973_v30, %v1975_v34  ;;  %v1987_v40 = vsel %vm1980_vm6, %v1975_v34, %v1977_v33 }
 0x121   : > { %3559 = vmatprep.subr.msk.mxu0 %vm344_vm1, %v1986_v35 }
 0x122   : > { %3560 = vmatpush1.msk.msra.mxu0 %vm344_vm1, %v1985_v36 }
 0x123   : > { %v2303_v37 = vpop.permute.xlu1 %2302  ;;  %v1979_v38 = vpop.permute.xlu0 %1978  ;;  %3561 = vmatmul.mubr.msk.f32.vlgmr.msra.gmra.mrb[2].mxu0 %vm340_vm2, %v3489_v29 }
 0x124   : > { %v1988_v39 = vsel %vm1980_vm6, %v1977_v33, %v1979_v38  ;;  %2410 = vmatprep.mubr.f32.mxu0 %v3906_v0 }
 0x125   : > { %3562 = vmatprep.subr.msk.mxu1 %vm344_vm1, %v1988_v39 }
 0x126   : > { %3563 = vmatpush1.msk.msra.mxu1 %vm344_vm1, %v1987_v40 }
 0x127   : > { %v2307_v41 = vpop.permute.xlu1 %2306  ;;  %v2305_v42 = vpop.permute.xlu0 %2304  ;;  %3564 = vmatmul.mubr.msk.f32.vlgmr.msra.gmra.mrb[2].mxu1 %vm340_vm2, %v3489_v29 }
 0x128   : > { %v2320_v43 = vsel %vm2318_vm7, %v2303_v37, %v2305_v42  ;;  %2481 = vmatprep.mubr.f32.mxu1 %v3906_v0  ;;  %v2321_v49 = vsel %vm2318_vm7, %v2305_v42, %v2307_v41 }
 0x129   : > { %3565 = vmatprep.subr.msk.mxu0 %vm344_vm1, %v2320_v43 }
 0x12b   : > { %v2301_v44 = vpop.permute.xlu1 %2300  ;;  %v2309_v45 = vpop.permute.xlu0 %2308 }
 0x12c   : > { %v2319_v47 = vsel %vm2318_vm7, %v2301_v44, %v2303_v37  ;;  %v2322_v48 = vsel %vm2318_vm7, %v2307_v41, %v2309_v45 }
 0x12d   : > { %3566 = vmatpush1.msk.msra.mxu0 %vm344_vm1, %v2319_v47  ;;  %3568 = vmatprep.subr.msk.mxu1 %vm344_vm1, %v2322_v48 }
 0x12e   : > { %3569 = vmatpush1.msk.msra.mxu1 %vm344_vm1, %v2321_v49  ;;  %3567 = vmatmul.mubr.msk.f32.vlgmr.msra.gmra.mrb[0].mxu0 %vm340_vm2, %v3490_v46 }
 0x12f   : > { %v2313_v50 = vpop.permute.xlu1 %2312  ;;  %v2311_v51 = vpop.permute.xlu0 %2310  ;;  %3570 = vmatmul.mubr.msk.f32.vlgmr.msra.gmra.mrb[0].mxu1 %vm340_vm2, %v3490_v46  ;;  %2552 = vmatprep.mubr.f32.mxu0 %v3906_v0 }
 0x130   : > { %v2323_v52 = vsel %vm2318_vm7, %v2309_v45, %v2311_v51  ;;  %v2324_v53 = vsel %vm2318_vm7, %v2311_v51, %v2313_v50  ;;  %2623 = vmatprep.mubr.f32.mxu1 %v3906_v0 }
 0x131   : > { %3571 = vmatprep.subr.msk.mxu0 %vm344_vm1, %v2324_v53 }
 0x132   : > { %3572 = vmatpush1.msk.msra.mxu0 %vm344_vm1, %v2323_v52 }
 0x133   : > { %v2317_v54 = vpop.permute.xlu1 %2316  ;;  %v2315_v55 = vpop.permute.xlu0 %2314  ;;  %3573 = vmatmul.mubr.msk.f32.vlgmr.msra.gmra.mrb[2].mxu0 %vm340_vm2, %v3490_v46 }
 0x134   : > { %v2325_v56 = vsel %vm2318_vm7, %v2313_v50, %v2315_v55  ;;  %v2326_v57 = vsel %vm2318_vm7, %v2315_v55, %v2317_v54  ;;  %2748 = vmatprep.mubr.f32.mxu0 %v3906_v0 }
 0x135   : > { %3574 = vmatprep.subr.msk.mxu1 %vm344_vm1, %v2326_v57 }
 0x136   : > { %3575 = vmatpush1.msk.msra.mxu1 %vm344_vm1, %v2325_v56 }
 0x137   : > { %v2643_v58 = vpop.permute.xlu1 %2642  ;;  %v2641_v59 = vpop.permute.xlu0 %2640  ;;  %3576 = vmatmul.mubr.msk.f32.vlgmr.msra.gmra.mrb[2].mxu1 %vm340_vm2, %v3490_v46 }
 0x138   : > { %v2658_v60 = vsel %vm2656_vm8, %v2641_v59, %v2643_v58  ;;  %2819 = vmatprep.mubr.f32.mxu1 %v3906_v0 }
 0x139   : > { %3577 = vmatprep.subr.msk.mxu0 %vm344_vm1, %v2658_v60 }
 0x13b   : > { %v2647_v61 = vpop.permute.xlu1 %2646  ;;  %v2645_v62 = vpop.permute.xlu0 %2644 }
 0x13c   : > { %v2659_v63 = vsel %vm2656_vm8, %v2643_v58, %v2645_v62  ;;  %v2660_v1 = vsel %vm2656_vm8, %v2645_v62, %v2647_v61 }
 0x13d   : > { %3580 = vmatprep.subr.msk.mxu1 %vm344_vm1, %v2660_v1 }
 0x13e   : > { %3581 = vmatpush1.msk.msra.mxu1 %vm344_vm1, %v2659_v63 }
 0x13f   : > { %v2649_v3 = vpop.permute.xlu1 %2648  ;;  %v2639_v4 = vpop.permute.xlu0 %2638  ;;  %3582 = vmatmul.mubr.msk.f32.vlgmr.msra.gmra.mrb[0].mxu1 %vm340_vm2, %v3491_v2 }
 0x140   : > { %v2657_v5 = vsel %vm2656_vm8, %v2639_v4, %v2641_v59  ;;  %2961 = vmatprep.mubr.f32.mxu1 %v3906_v0  ;;  %v2661_v9 = vsel %vm2656_vm8, %v2647_v61, %v2649_v3 }
 0x141   : > { %3578 = vmatpush1.msk.msra.mxu0 %vm344_vm1, %v2657_v5 }
 0x142   : > { %3579 = vmatmul.mubr.msk.f32.vlgmr.msra.gmra.mrb[0].mxu0 %vm340_vm2, %v3491_v2 }
 0x143   : > { %v2653_v6 = vpop.permute.xlu1 %2652  ;;  %2890 = vmatprep.mubr.f32.mxu0 %v3906_v0 }
 0x144   : > { %v2651_v7 = vpop.permute.xlu0 %2650 }
 0x145   : > { %v2662_v8 = vsel %vm2656_vm8, %v2649_v3, %v2651_v7  ;;  %v2663_v13 = vsel %vm2656_vm8, %v2651_v7, %v2653_v6 }
 0x146   : > { %3583 = vmatprep.subr.msk.mxu0 %vm344_vm1, %v2662_v8 }
 0x147   : > { %3584 = vmatpush1.msk.msra.mxu0 %vm344_vm1, %v2661_v9  ;;  %v2979_v10 = vpop.permute.xlu1 %2978 }
 0x148   : > { %v2655_v11 = vpop.permute.xlu0 %2654  ;;  %3585 = vmatmul.mubr.msk.f32.vlgmr.msra.gmra.mrb[2].mxu0 %vm340_vm2, %v3491_v2 }
 0x149   : > { %v2664_v12 = vsel %vm2656_vm8, %v2653_v6, %v2655_v11  ;;  %3086 = vmatprep.mubr.f32.mxu0 %v3906_v0 }
 0x14a   : > { %3586 = vmatprep.subr.msk.mxu1 %vm344_vm1, %v2664_v12 }
 0x14b   : > { %3587 = vmatpush1.msk.msra.mxu1 %vm344_vm1, %v2663_v13  ;;  %v2983_v14 = vpop.permute.xlu1 %2982 }
 0x14c   : > { %v2981_v15 = vpop.permute.xlu0 %2980  ;;  %3588 = vmatmul.mubr.msk.f32.vlgmr.msra.gmra.mrb[2].mxu1 %vm340_vm2, %v3491_v2 }
 0x14d   : > { %v2996_v16 = vsel %vm2994_vm9, %v2979_v10, %v2981_v15  ;;  %3157 = vmatprep.mubr.f32.mxu1 %v3906_v0  ;;  %v2997_v22 = vsel %vm2994_vm9, %v2981_v15, %v2983_v14 }
 0x14e   : > { %3589 = vmatprep.subr.msk.mxu0 %vm344_vm1, %v2996_v16 }
 0x14f   : > { %v2977_v17 = vpop.permute.xlu1 %2976 }
 0x150   : > { %v2995_v19 = vsel %vm2994_vm9, %v2977_v17, %v2979_v10  ;;  %v2985_v20 = vpop.permute.xlu0 %2984 }
 0x151   : > { %v2998_v21 = vsel %vm2994_vm9, %v2983_v14, %v2985_v20  ;;  %3590 = vmatpush1.msk.msra.mxu0 %vm344_vm1, %v2995_v19 }
 0x152   : > { %3592 = vmatprep.subr.msk.mxu1 %vm344_vm1, %v2998_v21  ;;  %3591 = vmatmul.mubr.msk.f32.vlgmr.msra.gmra.mrb[0].mxu0 %vm340_vm2, %v3492_v18 }
 0x153   : > { %3593 = vmatpush1.msk.msra.mxu1 %vm344_vm1, %v2997_v22  ;;  %v2989_v23 = vpop.permute.xlu1 %2988  ;;  %3228 = vmatprep.mubr.f32.mxu0 %v3906_v0 }
 0x154   : > { %v2987_v24 = vpop.permute.xlu0 %2986  ;;  %3594 = vmatmul.mubr.msk.f32.vlgmr.msra.gmra.mrb[0].mxu1 %vm340_vm2, %v3492_v18 }
 0x155   : > { %v2999_v25 = vsel %vm2994_vm9, %v2985_v20, %v2987_v24  ;;  %v3000_v26 = vsel %vm2994_vm9, %v2987_v24, %v2989_v23  ;;  %3299 = vmatprep.mubr.f32.mxu1 %v3906_v0 }
 0x156   : > { %3595 = vmatprep.subr.msk.mxu0 %vm344_vm1, %v3000_v26 }
 0x157   : > { %3596 = vmatpush1.msk.msra.mxu0 %vm344_vm1, %v2999_v25 }
 0x158   : > { %v2993_v27 = vpop.permute.xlu1 %2992  ;;  %v2991_v28 = vpop.permute.xlu0 %2990  ;;  %3597 = vmatmul.mubr.msk.f32.vlgmr.msra.gmra.mrb[2].mxu0 %vm340_vm2, %v3492_v18 }
 0x159   : > { %v3001_v29 = vsel %vm2994_vm9, %v2989_v23, %v2991_v28  ;;  %v3002_v30 = vsel %vm2994_vm9, %v2991_v28, %v2993_v27 }
 0x15a   : > { %3598 = vmatprep.subr.msk.mxu1 %vm344_vm1, %v3002_v30 }
 0x15b   : > { %3599 = vmatpush1.msk.msra.mxu1 %vm344_vm1, %v3001_v29 }
 0x15c   : > { %3600 = vmatmul.mubr.msk.f32.vlgmr.msra.gmra.mrb[2].mxu1 %vm340_vm2, %v3492_v18 }
 0x16e   : > { %v3317_v31 = vpop.permute.xlu0 %3316 }
 0x225   : > { %v3088_v0 = vpop.f32.mrb[0].mxu0 }
 0x226   : > { %v3319_v32 = vadd.f32 %v3317_v31, %v3088_v0  ;;  %v3090_v33 = vpop.f32.mrb[1].mxu0 }
 0x227   : > { %v3320_v34 = vadd.f32 %v3317_v31, %v3090_v33  ;;  %v3159_v35 = vpop.f32.mrb[0].mxu1 }
 0x228   : > { %v3327_v36 = vmax.f32 %v3319_v32, 0.0  ;;  %v3321_v37 = vadd.f32 %v3317_v31, %v3159_v35  ;;  %v3161_v38 = vpop.f32.mrb[1].mxu1 }
 0x229   : > { %v3328_v39 = vmax.f32 %v3320_v34, 0.0  ;;  %v3322_v40 = vadd.f32 %v3317_v31, %v3161_v38 }
 0x22a   : > { %3335 = vst [vmem:[%s276_s11] sm:$0xff] %v3327_v36  ;;  %v3329_v41 = vmax.f32 %v3321_v37, 0.0 }
 0x22b   : > { %3336 = vst [vmem:[%s276_s11 + $0x8] sm:$0xff] %v3328_v39  ;;  %v3330_v42 = vmax.f32 %v3322_v40, 0.0  ;;  %v3230_v43 = vpop.f32.mrb[2].mxu0 }
 0x22c   : > { %3337 = vst [vmem:[%s276_s11 + $0x10] sm:$0xff] %v3329_v41  ;;  %v3323_v44 = vadd.f32 %v3317_v31, %v3230_v43  ;;  %v3232_v45 = vpop.f32.mrb[3].mxu0 }
 0x22d   : > { %3338 = vst [vmem:[%s276_s11 + $0x18] sm:$0xff] %v3330_v42  ;;  %v3324_v46 = vadd.f32 %v3317_v31, %v3232_v45 }
 0x22e   : > { %v3331_v47 = vmax.f32 %v3323_v44, 0.0 }
 0x22f   : > { %v3332_v48 = vmax.f32 %v3324_v46, 0.0  ;;  %v3301_v49 = vpop.f32.mrb[2].mxu1 }
 0x230   : > { %3339 = vst [vmem:[%s276_s11 + $0x20] sm:$0xff] %v3331_v47  ;;  %v3325_v50 = vadd.f32 %v3317_v31, %v3301_v49  ;;  %v3303_v51 = vpop.f32.mrb[3].mxu1 }
 0x231   : > { %3340 = vst [vmem:[%s276_s11 + $0x28] sm:$0xff] %v3332_v48  ;;  %v3326_v52 = vadd.f32 %v3317_v31, %v3303_v51 }
 0x232   : > { %v3333_v53 = vmax.f32 %v3325_v50, 0.0 }
 0x233   : > { %v3334_v54 = vmax.f32 %v3326_v52, 0.0 }
 0x234   : > { %3341 = vst [vmem:[%s276_s11 + $0x30] sm:$0xff] %v3333_v53 }
 0x235   : > { %3342 = vst [vmem:[%s276_s11 + $0x38] sm:$0xff] %v3334_v54 }
 0x236   : > { %3829 = shalt.err (!%p3826_p2)
}
 0x237   : > { %s3830_s12 = scalar_lea.hbm %s4466_s25, 1024  ;;  %s3834_s24 = scalar_lea.hbm %s4519_s4, 2048 }
 0x238   : > { %p3831_p9 = scmp.ne.s32.totalorder %s4466_s25, %s3830_s12  ;;  %p3835_p6 = scmp.lt.u32.totalorder %s4466_s25, %s4519_s4 }
 0x239   : > { %p3836_p13 = scmp.lt.u32.totalorder %s3834_s24, %s3830_s12  ;;  %p3838_p8 = scmp.lt.u32.totalorder %s3830_s12, %s4466_s25 }
 0x23a   : > { %p3832_p11 = pnand %p3831_p9, %p4532_p0 }
 0x23b   : > { %p3837_p5 = por %p3836_p13, %p3835_p6 }
 0x23c   : > { %p3833_p3 = pneg %p3832_p11 }
 0x23d   : > { %p3839_p7 = por %p3838_p8, %p3837_p5 }
 0x23f   : > { %p3840_p4 = pnand %p3839_p7, %p3833_p3 }
 0x241   : > { %3843 = shalt.err (!%p3840_p4)
}
 0x242   : > { %3677 = dma.vmem_to_hbm [thread:$0]  (%p4532_p0), %s4468_s27, 1024, %s4466_s25, %s3344_s6  }
 0x243 PF: > { %s3372_s11 = sand.u32 1, %s3882_s15   ;;  %p4533_p10 = scmp.ne.s32.totalorder %s4525_s30, 0 }
 0x244   : > { %p4534_p12 = scmp.ge.s32.totalorder %s3902_s20, 2  ;;  %s3373_s21 = scalar_lea.sflag [#allocation4], %s3372_s11 }
 0x246   : > { %p3687_p1 = pnand %p4534_p12, %p4533_p10 }
 0x248   : > { %3877 = dma.done.wait (!%p3687_p1), %s3373_s21, 1024  }
 0x249   : > { %3879 = vsyncadd (!%p3687_p1), %s3373_s21, 4294966272  ;;  %s23_s20 = sadd.s32 1, %s3902_s20   ;;  %s4535_s15 = smov %s3886_s16 }
 0x24a   : > { %p20_p2 = scmp.ge.s32.totalorder %s23_s20, 4   ;;  %s4536_s16 = smov %s3890_s17 }
 0x24b   : > { %s4537_s17 = smov %s3998_s29  ;;  %s4538_s18 = smov %s3898_s19 }
 0x24c   : > { %s4539_s19 = smov %s4541_s23  ;;  %22 = sbr.rel (!%p20_p2) target bundleno = 8 (0x8), region = 102 }
 0x253   :  { %3378 = vsyncpa [#allocation3], 1 }
 0x254   :  { %3380 = vsyncpa [#allocation3 + $0x1], 1 }
 0x255   :  { %3381 = vsyncpa [#allocation6], 1 }
 0x256   :  { %3383 = vsyncpa [#allocation6 + $0x1], 1 }
 0x257   :  { %3384 = vsyncpa [#allocation4], 1 }
 0x258   :  { %3386 = vsyncpa [#allocation4 + $0x1], 1 }

</bundles_post_ra>
